<compile_context>
chip_gen: v5e
topology: v5e:2x2
jax: 0.10.0
libtpu: 0.0.40
codegen_flags: <defaults>
</compile_context>

<pallas_src>
import functools

import jax
import jax.numpy as jnp
from jax.experimental import pallas as pl
from jax.experimental.pallas import tpu as pltpu


def _masked_softlabel_kernel(x_ref, t_ref, out_ref, *, eps, n_rows, tn,
                             needs_row_mask):
    """One (tn, C) row-block -> its masked partial sum (scalar in SMEM)."""
    x = x_ref[...].astype(jnp.float32)
    t = t_ref[...].astype(jnp.float32)

    p = jax.nn.sigmoid(x)
    mask = t >= (0.0 - eps)

    if needs_row_mask:
        # Ragged N: the final grid block reads past row N; those rows hold
        # unspecified data, so mask them out with a sublane iota.  (jnp.where
        # is an exact select, so NaN/Inf garbage in masked rows cannot leak.)
        rows_left = n_rows - pl.program_id(0) * tn       # scalar, int32
        row_idx = jax.lax.broadcasted_iota(jnp.int32, x.shape, 0)
        mask = jnp.logical_and(mask, row_idx < rows_left)

    # Exact parity with the PyTorch module: eps inside the logs.
    elem = t * jnp.log(p + eps) + (1.0 - t) * jnp.log(1.0 - p + eps)
    contrib = jnp.where(mask, elem, jnp.float32(0.0))

    out_ref[0, 0] = jnp.sum(contrib)


def masked_softlabel_regression_loss(inputs, targets, eps=1e-6,
                                     target_tile_bytes=2 * 1024 * 1024):
    """inputs, targets: (N, C) float arrays. Returns a scalar float32 loss."""
    assert inputs.shape == targets.shape, (inputs.shape, targets.shape)
    N, C = inputs.shape

    # VMEM budgeting uses the lane-padded width (Mosaic pads lanes to 128).
    c_pad = max(128, ((C + 127) // 128) * 128)

    # Row-block size: largest multiple of 8 whose f32 tile stays under
    # target_tile_bytes per input per pipeline buffer (2 inputs x 2 buffers
    # => ~4x that of VMEM), capped by what N actually needs.
    # TODO(synk): extremely large C (c_pad*4*8 > target_tile_bytes) would need
    # an extra grid axis over C; not needed for the shapes this module sees.
    tn = (target_tile_bytes // (c_pad * 4)) // 8 * 8
    tn = max(8, min(tn, ((N + 7) // 8) * 8, 1024))

    num_blocks = pl.cdiv(N, tn)
    needs_row_mask = (N % tn) != 0

    kernel = functools.partial(_masked_softlabel_kernel, eps=float(eps),
                               n_rows=N, tn=tn, needs_row_mask=needs_row_mask)

    partials = pl.pallas_call(
        kernel,
        out_shape=jax.ShapeDtypeStruct((num_blocks, 1), jnp.float32),
        grid=(num_blocks,),
        in_specs=[
            # Full C per block: legal for any C because it equals the array
            # dim; row dim tn is a multiple of 8.
            pl.BlockSpec((tn, C), lambda i: (i, 0)),
            pl.BlockSpec((tn, C), lambda i: (i, 0)),
        ],
        out_specs=pl.BlockSpec((1, 1), lambda i: (i, 0),
                               memory_space=pltpu.SMEM),
        compiler_params=pltpu.CompilerParams(
            dimension_semantics=("parallel",)),
    )(inputs, targets)

    return -jnp.sum(partials) / jnp.float32(N)


def _reference_loss(inputs, targets, eps=1e-6):
    """Plain-JAX reference mirroring the PyTorch forward."""
    p = jax.nn.sigmoid(inputs.astype(jnp.float32))
    t = targets.astype(jnp.float32)
    mask = t >= (0.0 - eps)
    elem = t * jnp.log(p + eps) + (1.0 - t) * jnp.log(1.0 - p + eps)
    return -jnp.sum(jnp.where(mask, elem, 0.0)) / inputs.shape[0]


if __name__ == "__main__":
    key = jax.random.PRNGKey(0)
    k1, k2 = jax.random.split(key)

    # Small tile-aligned case.
    N, C = 16, 256
    inputs = jax.random.normal(k1, (N, C), dtype=jnp.float32)
    # targets in [-0.5, 1.0): negatives get masked out, like the PyTorch module.
    targets = jax.random.uniform(k2, (N, C), minval=-0.5, maxval=1.0,
                                 dtype=jnp.float32)
    loss = jax.block_until_ready(masked_softlabel_regression_loss(inputs, targets))
    ref = jax.block_until_ready(_reference_loss(inputs, targets))
    assert jnp.allclose(loss, ref, rtol=1e-4, atol=1e-4), (loss, ref)

    # Ragged case exercising the in-kernel row-masking path (no host-side pad).
    k3, k4 = jax.random.split(k2)
    N2, C2 = 23, 300
    inputs2 = jax.random.normal(k3, (N2, C2), dtype=jnp.float32)
    targets2 = jax.random.uniform(k4, (N2, C2), minval=-0.5, maxval=1.0,
                                  dtype=jnp.float32)
    loss2 = jax.block_until_ready(masked_softlabel_regression_loss(inputs2, targets2))
    ref2 = jax.block_until_ready(_reference_loss(inputs2, targets2))
    assert jnp.allclose(loss2, ref2, rtol=1e-4, atol=1e-4), (loss2, ref2)

    print("KERNEL_OK")
</pallas_src>

<mosaic_0001>
module attributes {stable_mosaic.version = 11 : i64} {
  func.func @_masked_softlabel_kernel(%arg0: i32, %arg1: memref<16x256xf32, #tpu.memory_space<vmem>>, %arg2: memref<16x256xf32, #tpu.memory_space<vmem>>, %arg3: memref<1x1xf32, #tpu.memory_space<smem>>) attributes {dimension_semantics = [#tpu.dimension_semantics<parallel>], iteration_bounds = array<i64: 1>, scalar_prefetch = 0 : i64, scratch_operands = 0 : i64, tpu.core_type = #tpu.core_type<tc>, window_params = [{transform_indices = @transform_0, window_bounds = array<i64: 16, 256>}, {transform_indices = @transform_1, window_bounds = array<i64: 16, 256>}, {transform_indices = @transform_2, window_bounds = array<i64: 1, 1>}]} {
    %c0 = arith.constant 0 : index
    %c0_0 = arith.constant 0 : index
    %0 = vector.load %arg1[%c0, %c0_0] : memref<16x256xf32, #tpu.memory_space<vmem>>, vector<16x256xf32>
    %c0_1 = arith.constant 0 : index
    %c0_2 = arith.constant 0 : index
    %1 = vector.load %arg2[%c0_1, %c0_2] : memref<16x256xf32, #tpu.memory_space<vmem>>, vector<16x256xf32>
    %2 = arith.negf %0 : vector<16x256xf32>
    %3 = math.exp %2 : vector<16x256xf32>
    %cst = arith.constant 1.000000e+00 : f32
    %4 = vector.broadcast %cst : f32 to vector<16x256xf32>
    %5 = arith.addf %4, %3 : vector<16x256xf32>
    %6 = arith.divf %4, %5 : vector<16x256xf32>
    %cst_3 = arith.constant -9.99999997E-7 : f32
    %7 = vector.broadcast %cst_3 : f32 to vector<16x256xf32>
    %8 = arith.cmpf oge, %1, %7 : vector<16x256xf32>
    %cst_4 = arith.constant 9.99999997E-7 : f32
    %9 = vector.broadcast %cst_4 : f32 to vector<16x256xf32>
    %10 = arith.addf %6, %9 : vector<16x256xf32>
    %11 = math.log %10 : vector<16x256xf32>
    %12 = arith.mulf %1, %11 : vector<16x256xf32>
    %cst_5 = arith.constant 1.000000e+00 : f32
    %13 = vector.broadcast %cst_5 : f32 to vector<16x256xf32>
    %14 = arith.subf %13, %1 : vector<16x256xf32>
    %cst_6 = arith.constant 1.000000e+00 : f32
    %15 = vector.broadcast %cst_6 : f32 to vector<16x256xf32>
    %16 = arith.subf %15, %6 : vector<16x256xf32>
    %cst_7 = arith.constant 9.99999997E-7 : f32
    %17 = vector.broadcast %cst_7 : f32 to vector<16x256xf32>
    %18 = arith.addf %16, %17 : vector<16x256xf32>
    %19 = math.log %18 : vector<16x256xf32>
    %20 = arith.mulf %14, %19 : vector<16x256xf32>
    %21 = arith.addf %12, %20 : vector<16x256xf32>
    %cst_8 = arith.constant 0.000000e+00 : f32
    %22 = vector.broadcast %cst_8 : f32 to vector<16x256xf32>
    %23 = arith.select %8, %21, %22 : vector<16x256xi1>, vector<16x256xf32>
    %24 = vector.shape_cast %23 : vector<16x256xf32> to vector<1x16x256xf32>
    %cst_9 = arith.constant dense<0.000000e+00> : vector<1xf32>
    %25 = vector.multi_reduction <add>, %24, %cst_9 [1, 2] : vector<1x16x256xf32> to vector<1xf32>
    %26 = vector.shape_cast %25 : vector<1xf32> to vector<1x1x1xf32>
    %27 = vector.extract %26[0, 0, 0] : f32 from vector<1x1x1xf32>
    %c0_10 = arith.constant 0 : index
    %c0_11 = arith.constant 0 : index
    %28 = memref.load %arg3[%c0_10, %c0_11] : memref<1x1xf32, #tpu.memory_space<smem>>
    memref.store %27, %arg3[%c0_10, %c0_11] : memref<1x1xf32, #tpu.memory_space<smem>>
    return
  }
  func.func @transform_0(%arg0: i32) -> (i32, i32) {
    %c0_i32 = arith.constant 0 : i32
    %c0_i32_0 = arith.constant 0 : i32
    return %arg0, %c0_i32 : i32, i32
  }
  func.func @transform_1(%arg0: i32) -> (i32, i32) {
    %c0_i32 = arith.constant 0 : i32
    %c0_i32_0 = arith.constant 0 : i32
    return %arg0, %c0_i32 : i32, i32
  }
  func.func @transform_2(%arg0: i32) -> (i32, i32) {
    %c0_i32 = arith.constant 0 : i32
    %c0_i32_0 = arith.constant 0 : i32
    return %arg0, %c0_i32 : i32, i32
  }
}

</mosaic_0001>

<bundles_post_ra>
// kernel: tpu_custom_call.1
= control target key start
LH: loop header
LB: loop body
LE: loop exit
PB: predicated region body
PF: predicated region fallthrough
CT: control target
= control target key end

     0   :  { %7 = vsyncpa [#allocation3], 0  ;;  %s383_s0 = inlined_call_operand.hbm [shape: f32[16,256], index: 0, kind: input, shape index: {}]   ;;  %s384_s1 = inlined_call_operand.hbm [shape: f32[16,256], index: 1, kind: input, shape index: {}]   ;;  %s385_s2 = inlined_call_operand.hbm [shape: f32[1,1], index: 2, kind: output, shape index: {}]  }
   0x1   :  { %8 = vsyncpa [#allocation6], 0 }
   0x2   :  { %9 = vsyncpa [#allocation4], 0  ;;  %s14_s11 = sshll.u32 %s383_s0, 4  ;;  %s320_s12 = smov [#allocation2]   ;;  %s15_s11 = int_to_ptr.hbm [resolvable:$true] %s14_s11 }
   0x3   :  { %s16_s13 = sshll.u32 %s320_s12, 4  ;;  %s27_s16 = sshll.u32 %s384_s1, 4  ;;  %s17_s13 = int_to_ptr.vmem [resolvable:$true] %s16_s13  ;;  %s28_s16 = int_to_ptr.hbm [resolvable:$true] %s27_s16 }
   0x4   :  { %s321_s17 = smov 256   ;;  %s322_s18 = smov 16  }
   0x5   :  { %22 = dma.hbm_to_vmem [thread:$0]  %s15_s11, 512, %s17_s13, [#allocation3], %s321_s17, %s321_s17, %s322_s18  }
   0x6   :  { %s323_s19 = smov [#allocation5]  }
   0x7   :  { %s29_s20 = sshll.u32 %s323_s19, 4  ;;  %s30_s20 = int_to_ptr.vmem [resolvable:$true] %s29_s20 }
   0x8   :  { %35 = dma.hbm_to_vmem [thread:$0]  %s28_s16, 512, %s30_s20, [#allocation6], %s321_s17, %s321_s17, %s322_s18  }
   0x9   :  { %314 = dma.done.wait [#allocation3], 512  }
   0xa   :  { %315 = vsyncadd [#allocation3], 4294966784 }
   0xb   :  { %316 = dma.done.wait [#allocation6], 512  }
   0xc   :  { %317 = vsyncadd [#allocation6], 4294966784  ;;  %v44_v0 = vld [vmem:[#allocation2] sm:$0xff]  ;;  %v45_v1 = vld [vmem:[#allocation2 + $0x8] sm:$0xff]  ;;  %s199_s21 = sshll.u32 %s385_s2, 4  ;;  %s324_s23 = smov [#allocation7]   ;;  %s200_s21 = int_to_ptr.hbm [resolvable:$true] %s199_s21 }
   0xd   :  { %v46_v2 = vld [vmem:[#allocation2 + $0x10] sm:$0xff]  ;;  %v47_v3 = vld [vmem:[#allocation2 + $0x18] sm:$0xff]  ;;  %v211_v4 = vmul.f32 -1.442695, %v44_v0  ;;  %v212_v5 = vmul.f32 -1.442695, %v45_v1 }
   0xe   :  { %v213_v6 = vmul.f32 -1.442695, %v46_v2  ;;  %v214_v7 = vmul.f32 -1.442695, %v47_v3 }
   0xf   :  { %222 = vpow2.f32 %v211_v4 }
  0x10   :  { %224 = vpow2.f32 %v212_v5 }
  0x11   :  { %226 = vpow2.f32 %v213_v6 }
  0x12   :  { %228 = vpow2.f32 %v214_v7 }
  0x15   :  { %v223_v8 = vpop.eup %222 }
  0x16   :  { %v225_v9 = vpop.eup %224  ;;  %v64_v10 = vadd.f32 1.0, %v223_v8 }
  0x17   :  { %v227_v11 = vpop.eup %226  ;;  %v65_v12 = vadd.f32 1.0, %v225_v9  ;;  %v48_v9 = vld [vmem:[#allocation5] sm:$0xff] }
  0x18   :  { %v229_v13 = vpop.eup %228  ;;  %v66_v14 = vadd.f32 1.0, %v227_v11  ;;  %230 = vrcp.f32 %v64_v10  ;;  %v77_v16 = vand.u32 2147483647, %v64_v10  ;;  %v79_v17 = vand.u32 2147483648, %v64_v10 }
  0x19   :  { %v67_v15 = vadd.f32 1.0, %v229_v13  ;;  %232 = vrcp.f32 %v65_v12  ;;  %v94_v19 = vand.u32 2147483648, %v65_v12  ;;  %vm73_vm0 = vweird.f32 %v64_v10 }
  0x1a   :  { %234 = vrcp.f32 %v66_v14  ;;  %vm346_vm1 = vcmp.eq.f32.partialorder %v77_v16, 8.507059e+37  ;;  %vm88_vm2 = vweird.f32 %v65_v12  ;;  %v80_v24 = vor.u32 1.1754944e-38, %v79_v17 }
  0x1b   :  { %236 = vrcp.f32 %v67_v15  ;;  %v92_v26 = vand.u32 2147483647, %v65_v12  ;;  %vm103_vm3 = vweird.f32 %v66_v14  ;;  %v107_v29 = vand.u32 2147483647, %v66_v14 }
  0x1c   :  { %v95_v32 = vor.u32 1.1754944e-38, %v94_v19  ;;  %v109_v33 = vand.u32 2147483648, %v66_v14  ;;  %vm118_vm8 = vweird.f32 %v67_v15  ;;  %v122_v39 = vand.u32 2147483647, %v67_v15  ;;  %v51_v19 = vld [vmem:[#allocation5 + $0x18] sm:$0xff] }
  0x1d   :  { %v124_v40 = vand.u32 2147483648, %v67_v15  ;;  %vm93_vm11 = vcmp.eq.f32.partialorder %v92_v26, 8.507059e+37  ;;  %vm108_vm13 = vcmp.eq.f32.partialorder %v107_v29, 8.507059e+37  ;;  %v148_v17 = vsub.f32 1.0, %v48_v9 }
  0x1e   :  { %v231_v18 = vpop.eup %230  ;;  %v110_v47 = vor.u32 1.1754944e-38, %v109_v33  ;;  %vm123_vm15 = vcmp.eq.f32.partialorder %v122_v39, 8.507059e+37 }
  0x1f   :  { %v233_v20 = vpop.eup %232  ;;  %v69_v21 = vmul.f32 %v231_v18, %v64_v10  ;;  %vm74_vm4 = vweird.f32 %v231_v18  ;;  %v125_v54 = vor.u32 1.1754944e-38, %v124_v40 }
  0x20   :  { %v235_v23 = vpop.eup %234  ;;  %v84_v25 = vmul.f32 %v233_v20, %v65_v12  ;;  %vm89_vm5 = vweird.f32 %v233_v20  ;;  %vm351_vm7 = vmor %vm73_vm0, %vm74_vm4  ;;  %v49_v12 = vld [vmem:[#allocation5 + $0x8] sm:$0xff]  ;;  %vm128_vm0 = vcmp.ge.f32.partialorder %v48_v9, -1e-06 }
  0x21   :  { %v70_v27 = vsub.f32 1.0, %v69_v21  ;;  %v99_v28 = vmul.f32 %v235_v23, %v66_v14  ;;  %v237_v30 = vpop.eup %236  ;;  %vm104_vm6 = vweird.f32 %v235_v23  ;;  %vm356_vm9 = vmor %vm88_vm2, %vm89_vm5 }
  0x22   :  { %v85_v31 = vsub.f32 1.0, %v84_v25  ;;  %v114_v36 = vmul.f32 %v237_v30, %v67_v15  ;;  %vm119_vm10 = vweird.f32 %v237_v30  ;;  %vm361_vm12 = vmor %vm103_vm3, %vm104_vm6  ;;  %v50_v15 = vld [vmem:[#allocation5 + $0x10] sm:$0xff]  ;;  %vm131_vm3 = vcmp.ge.f32.partialorder %v51_v19, -1e-06 }
  0x23   :  { %v71_v34 = vmul.f32 %v231_v18, %v70_v27  ;;  %v100_v35 = vsub.f32 1.0, %v99_v28  ;;  %vm372_vm14 = vmor %vm118_vm8, %vm119_vm10  ;;  %v150_v27 = vsub.f32 1.0, %v50_v15  ;;  %vm130_vm2 = vcmp.ge.f32.partialorder %v50_v15, -1e-06 }
  0x24   :  { %v86_v38 = vmul.f32 %v233_v20, %v85_v31  ;;  %v115_v44 = vsub.f32 1.0, %v114_v36 }
  0x25   :  { %v72_v41 = vadd.f32 %v231_v18, %v71_v34  ;;  %v101_v43 = vmul.f32 %v235_v23, %v100_v35 }
  0x26   :  { %v87_v45 = vadd.f32 %v233_v20, %v86_v38  ;;  %v116_v50 = vmul.f32 %v237_v30, %v115_v44 }
  0x27   :  { %v76_v48 = vsel %vm351_vm7, %v231_v18, %v72_v41  ;;  %v102_v49 = vadd.f32 %v235_v23, %v101_v43 }
  0x28   :  { %v81_v51 = vsel %vm346_vm1, %v80_v24, %v76_v48  ;;  %v91_v52 = vsel %vm356_vm9, %v233_v20, %v87_v45  ;;  %v117_v57 = vadd.f32 %v237_v30, %v116_v50  ;;  %vm129_vm1 = vcmp.ge.f32.partialorder %v49_v12, -1e-06 }
  0x29   :  { %v96_v55 = vsel %vm93_vm11, %v95_v32, %v91_v52  ;;  %v106_v56 = vsel %vm361_vm12, %v235_v23, %v102_v49  ;;  %v132_v58 = vadd.f32 1e-06, %v81_v51  ;;  %v152_v61 = vsub.f32 1.0, %v81_v51 }
  0x2a   :  { %v111_v59 = vsel %vm108_vm13, %v110_v47, %v106_v56  ;;  %v133_v60 = vadd.f32 1e-06, %v96_v55  ;;  %v153_v62 = vsub.f32 1.0, %v96_v55  ;;  %v121_v63 = vsel %vm372_vm14, %v237_v30, %v117_v57 }
  0x2b   :  { %v134_v0 = vadd.f32 1e-06, %v111_v59  ;;  %238 = vlog2.f32 %v132_v58  ;;  %v154_v1 = vsub.f32 1.0, %v111_v59  ;;  %v126_v2 = vsel %vm123_vm15, %v125_v54, %v121_v63 }
  0x2c   :  { %240 = vlog2.f32 %v133_v60  ;;  %v156_v3 = vadd.f32 1e-06, %v152_v61  ;;  %v157_v4 = vadd.f32 1e-06, %v153_v62  ;;  %v135_v5 = vadd.f32 1e-06, %v126_v2 }
  0x2d   :  { %242 = vlog2.f32 %v134_v0  ;;  %v155_v6 = vsub.f32 1.0, %v126_v2  ;;  %v158_v7 = vadd.f32 1e-06, %v154_v1  ;;  %v149_v23 = vsub.f32 1.0, %v49_v12 }
  0x2e   :  { %244 = vlog2.f32 %v156_v3  ;;  %v151_v30 = vsub.f32 1.0, %v51_v19 }
  0x2f   :  { %246 = vlog2.f32 %v135_v5  ;;  %v159_v8 = vadd.f32 1e-06, %v155_v6 }
  0x30   :  { %248 = vlog2.f32 %v157_v4 }
  0x31   :  { %v239_v10 = vpop.eup %238  ;;  %250 = vlog2.f32 %v158_v7 }
  0x32   :  { %v241_v11 = vpop.eup %240  ;;  %v137_v13 = vmul.f32 0.6931472, %v239_v10  ;;  %252 = vlog2.f32 %v159_v8 }
  0x33   :  { %v243_v14 = vpop.eup %242  ;;  %v139_v16 = vmul.f32 0.6931472, %v241_v11 }
  0x34   :  { %v245_v18 = vpop.eup %244  ;;  %v141_v20 = vmul.f32 0.6931472, %v243_v14  ;;  %v144_v22 = vmul.f32 %v137_v13, %v48_v9 }
  0x35   :  { %v247_v21 = vpop.eup %246  ;;  %v161_v24 = vmul.f32 0.6931472, %v245_v18  ;;  %v145_v29 = vmul.f32 %v139_v16, %v49_v12 }
  0x36   :  { %v249_v25 = vpop.eup %248  ;;  %v143_v26 = vmul.f32 0.6931472, %v247_v21  ;;  %v146_v34 = vmul.f32 %v141_v20, %v50_v15 }
  0x37   :  { %v251_v28 = vpop.eup %250  ;;  %v163_v31 = vmul.f32 0.6931472, %v249_v25  ;;  %v168_v32 = vmul.f32 %v161_v24, %v148_v17 }
  0x38   :  { %v253_v33 = vpop.eup %252  ;;  %v165_v35 = vmul.f32 0.6931472, %v251_v28  ;;  %v147_v36 = vmul.f32 %v143_v26, %v51_v19 }
  0x39   :  { %v167_v37 = vmul.f32 0.6931472, %v253_v33  ;;  %v169_v38 = vmul.f32 %v163_v31, %v149_v23  ;;  %v172_v39 = vadd.f32 %v168_v32, %v144_v22 }
  0x3a   :  { %v170_v40 = vmul.f32 %v165_v35, %v150_v27 }
  0x3b   :  { %v171_v41 = vmul.f32 %v167_v37, %v151_v30  ;;  %v173_v42 = vadd.f32 %v169_v38, %v145_v29  ;;  %v176_v43 = vsel %vm128_vm0, %v172_v39, 0.0 }
  0x3c   :  { %v174_v44 = vadd.f32 %v170_v40, %v146_v34 }
  0x3d   :  { %v175_v45 = vadd.f32 %v171_v41, %v147_v36  ;;  %v177_v46 = vsel %vm129_vm1, %v173_v42, 0.0 }
  0x3e   :  { %v178_v47 = vsel %vm130_vm2, %v174_v44, 0.0  ;;  %v180_v48 = vadd.f32 %v177_v46, %v176_v43 }
  0x3f   :  { %v179_v49 = vsel %vm131_vm3, %v175_v45, 0.0 }
  0x40   :  { %v181_v50 = vadd.f32 %v180_v48, %v178_v47 }
  0x42   :  { %v182_v51 = vadd.f32 %v181_v50, %v179_v49 }
  0x44   :  { %183 = vadd.xlane.f32.xlu0 %v182_v51 }
  0xb7   :  { %v184_v52 = vpop.xlane.xlu0 %183 }
  0xb8   :  { %v185_v53 = vrot.slane %v184_v52, 4 }
  0xba   :  { %v186_v54 = vadd.f32 %v185_v53, %v184_v52 }
  0xbc   :  { %v187_v55 = vrot.slane %v186_v54, 2 }
  0xbe   :  { %v188_v56 = vadd.f32 %v187_v55, %v186_v54 }
  0xc0   :  { %v189_v57 = vrot.slane %v188_v56, 1 }
  0xc2   :  { %v190_v58 = vadd.f32 %v189_v57, %v188_v56 }
  0xc4   :  { %215 = vpush %v190_v58 }
  0xf5   :  { %s216_s22 = spop %215 }
  0xf6   :  { %193 = sst [smem:[#allocation7]] %s216_s22 }
  0xf7   :  { %202 = dma.smem_to_hbm %s324_s23, 16, %s200_s21, [#allocation4]  }
  0xf8   :  { %318 = dma.done.wait [#allocation4], 16  }
  0xf9   :  { %319 = vsyncadd [#allocation4], 4294967280 }
  0xfa   :  { %207 = sfence }
  0xfb   :  { %208 = vsyncpa [#allocation3], 1 }
  0xfc   :  { %209 = vsyncpa [#allocation6], 1 }
  0xfd   :  { %210 = vsyncpa [#allocation4], 1 }

</bundles_post_ra>
